<compile_context>
chip_gen: v6e
topology: v6e:2x2x1
jax: 0.10.0
libtpu: 0.0.40
codegen_flags: <defaults>
</compile_context>

<pallas_src>
import jax
import jax.numpy as jnp
from jax.experimental import pallas as pl
from jax.experimental.pallas import tpu as pltpu


def _round_up(x, m):
    return (x + m - 1) // m * m


def _mlp_geglu_kernel(x_ref, wcat_ref, bcat_ref, w2_ref, b2_ref, o_ref, acc_ref):
    # x_ref:    (tm, Cp)        token tile (re-used across all hidden chunks)
    # wcat_ref: (Cp, 2*th)      fused [w11_chunk | w12_chunk]
    # bcat_ref: (1, 2*th)       fused [b11_chunk | b12_chunk]
    # w2_ref:   (th, Op)        fc2 weight chunk
    # b2_ref:   (1, Op)
    # o_ref:    (tm, Op)        output tile (written once, at the last chunk)
    # acc_ref:  (tm, Op) f32    VMEM accumulator over hidden chunks
    k = pl.program_id(1)

    @pl.when(k == 0)
    def _():
        acc_ref[...] = jnp.zeros_like(acc_ref)

    th = wcat_ref.shape[1] // 2
    x = x_ref[...]

    # One MXU matmul computes both the gate (fc11) and value (fc12) branches
    # for this hidden chunk.
    h12 = jnp.dot(x, wcat_ref[...], preferred_element_type=jnp.float32)
    h12 = h12 + bcat_ref[...].astype(jnp.float32)

    h1 = jnp.maximum(h12[:, :th], 0.0)   # ReLU(fc11(x))  -- gate branch
    h2 = h12[:, th:]                     # fc12(x)        -- value branch
    h = h1 * h2                          # GEGLU-style gating

    # TODO(synk): nn.Dropout(drop=0.0) is the identity; no stochastic masking emitted.

    # Partial fc2 for this hidden chunk, accumulated in f32.
    acc_ref[...] += jnp.dot(h.astype(w2_ref.dtype), w2_ref[...],
                            preferred_element_type=jnp.float32)

    @pl.when(k == pl.num_programs(1) - 1)
    def _():
        o_ref[...] = (acc_ref[...] + b2_ref[...].astype(jnp.float32)).astype(o_ref.dtype)


def mlp_geglu(x, w11, b11, w12, b12, w2, b2, *, tm=256, th=256):
    """x: (B, N, C).  Weights are (in, out) layout; biases (out,)."""
    B, N, C = x.shape
    H = w11.shape[1]
    O = w2.shape[1]
    M = B * N
    out_dtype = x.dtype
    itemsize = jnp.dtype(x.dtype).itemsize

    # --- tile sizes & padded dims (lane / MXU alignment: multiples of 128) ---
    tm = min(tm, _round_up(M, 8))
    Mp = _round_up(M, tm)
    Cp = _round_up(C, 128)
    th = min(th, _round_up(H, 128))
    Hp = _round_up(H, th)
    Op = _round_up(O, 128)
    n_m = Mp // tm
    n_h = Hp // th

    # --- wrapper-side zero padding (mathematically inert; sliced off after) ---
    x2d = jnp.pad(x.reshape(M, C), ((0, Mp - M), (0, Cp - C)))
    w11p = jnp.pad(w11, ((0, Cp - C), (0, Hp - H)))
    w12p = jnp.pad(w12, ((0, Cp - C), (0, Hp - H)))
    b11p = jnp.pad(b11, (0, Hp - H))
    b12p = jnp.pad(b12, (0, Hp - H))
    w2p = jnp.pad(w2, ((0, Hp - H), (0, Op - O)))
    b2p = jnp.pad(b2, (0, Op - O)).reshape(1, Op)

    # --- fuse fc11/fc12: per H-chunk contiguous [gate | value] layout ---
    wcat = jnp.concatenate(
        [w11p.reshape(Cp, n_h, th), w12p.reshape(Cp, n_h, th)], axis=-1
    ).reshape(Cp, n_h * 2 * th)
    bcat = jnp.concatenate(
        [b11p.reshape(n_h, th), b12p.reshape(n_h, th)], axis=-1
    ).reshape(1, n_h * 2 * th)

    # --- explicit VMEM budget: double-buffered input/output tiles + scratch ---
    tile_bytes = (tm * Cp + Cp * 2 * th + 2 * th + th * Op + Op + tm * Op) * itemsize
    vmem_limit = min(int(2 * tile_bytes * 1.5) + tm * Op * 4 + (1 << 20),
                     96 * 1024 * 1024)

    out2d = pl.pallas_call(
        _mlp_geglu_kernel,
        out_shape=jax.ShapeDtypeStruct((Mp, Op), out_dtype),
        grid_spec=pltpu.PrefetchScalarGridSpec(
            num_scalar_prefetch=0,
            grid=(n_m, n_h),
            in_specs=[
                pl.BlockSpec((tm, Cp), lambda i, k: (i, 0)),      # x tile
                pl.BlockSpec((Cp, 2 * th), lambda i, k: (0, k)),  # fused [w11|w12] chunk
                pl.BlockSpec((1, 2 * th), lambda i, k: (0, k)),   # fused [b11|b12] chunk
                pl.BlockSpec((th, Op), lambda i, k: (k, 0)),      # w2 chunk
                pl.BlockSpec((1, Op), lambda i, k: (0, 0)),       # b2
            ],
            out_specs=pl.BlockSpec((tm, Op), lambda i, k: (i, 0)),
            scratch_shapes=[pltpu.VMEM((tm, Op), jnp.float32)],
        ),
        compiler_params=pltpu.CompilerParams(
            dimension_semantics=("parallel", "arbitrary"),
            vmem_limit_bytes=vmem_limit,
        ),
    )(x2d, wcat, bcat, w2p, b2p)

    return out2d[:M, :O].reshape(B, N, O)


def _reference(x, w11, b11, w12, b12, w2, b2):
    h = jnp.maximum(x @ w11 + b11, 0.0) * (x @ w12 + b12)
    return h @ w2 + b2


if __name__ == "__main__":
    # Small shapes consistent with the module: (batch, tokens, channels)
    B, N = 2, 64
    in_features, hidden_features, out_features = 32, 64, 32

    key = jax.random.PRNGKey(0)
    kx, k11w, k11b, k12w, k12b, k2w, k2b = jax.random.split(key, 7)

    x = jax.random.normal(kx, (B, N, in_features), dtype=jnp.float32)

    # Deterministic parameter init (uniform, like nn.Linear's default scale).
    def lin_init(kw, kb, fan_in, fan_out):
        bound = 1.0 / (fan_in ** 0.5)
        w = jax.random.uniform(kw, (fan_in, fan_out), jnp.float32, -bound, bound)
        b = jax.random.uniform(kb, (fan_out,), jnp.float32, -bound, bound)
        return w, b

    w11, b11 = lin_init(k11w, k11b, in_features, hidden_features)
    w12, b12 = lin_init(k12w, k12b, in_features, hidden_features)
    w2, b2 = lin_init(k2w, k2b, hidden_features, out_features)

    out = mlp_geglu(x, w11, b11, w12, b12, w2, b2)
    out = jax.block_until_ready(out)

    ref = _reference(x, w11, b11, w12, b12, w2, b2)
    assert out.shape == (B, N, out_features)
    assert jnp.allclose(out, ref, atol=1e-5, rtol=1e-5), "mismatch vs reference"

    print("KERNEL_OK")
</pallas_src>

<mosaic_0001>
module attributes {stable_mosaic.version = 11 : i64} {
  func.func @_mlp_geglu_kernel(%arg0: i32, %arg1: i32, %arg2: memref<128x128xf32, #tpu.memory_space<vmem>>, %arg3: memref<128x256xf32, #tpu.memory_space<vmem>>, %arg4: memref<1x256xf32, #tpu.memory_space<vmem>>, %arg5: memref<128x128xf32, #tpu.memory_space<vmem>>, %arg6: memref<1x128xf32, #tpu.memory_space<vmem>>, %arg7: memref<128x128xf32, #tpu.memory_space<vmem>>, %arg8: memref<128x128xf32, #tpu.memory_space<vmem>>) attributes {dimension_semantics = [#tpu.dimension_semantics<parallel>, #tpu.dimension_semantics<arbitrary>], iteration_bounds = array<i64: 1, 1>, scalar_prefetch = 0 : i64, scratch_operands = 1 : i64, tpu.core_type = #tpu.core_type<tc>, window_params = [{transform_indices = @transform_0, window_bounds = array<i64: 128, 128>}, {transform_indices = @transform_1, window_bounds = array<i64: 128, 256>}, {transform_indices = @transform_2, window_bounds = array<i64: 1, 256>}, {transform_indices = @transform_3, window_bounds = array<i64: 128, 128>}, {pipeline_mode = #tpu.pipeline_mode<synchronous>, transform_indices = @transform_4, window_bounds = array<i64: 1, 128>}, {transform_indices = @transform_5, window_bounds = array<i64: 128, 128>}]} {
    %c0_i32 = arith.constant 0 : i32
    %0 = arith.cmpi eq, %arg1, %c0_i32 : i32
    %1 = arith.extui %0 : i1 to i32
    %c0_i32_0 = arith.constant 0 : i32
    %2 = arith.cmpi ne, %1, %c0_i32_0 : i32
    scf.if %2 {
      %cst_16 = arith.constant 0.000000e+00 : f32
      %22 = vector.broadcast %cst_16 : f32 to vector<128x128xf32>
      %c0_17 = arith.constant 0 : index
      %c0_18 = arith.constant 0 : index
      %23 = vector.load %arg8[%c0_17, %c0_18] : memref<128x128xf32, #tpu.memory_space<vmem>>, vector<128x128xf32>
      tpu.vector_store %arg8[%c0_17, %c0_18], %22 {strides = array<i32>} : memref<128x128xf32, #tpu.memory_space<vmem>>, vector<128x128xf32>,
    } else {
    }
    %c0 = arith.constant 0 : index
    %c0_1 = arith.constant 0 : index
    %3 = vector.load %arg2[%c0, %c0_1] : memref<128x128xf32, #tpu.memory_space<vmem>>, vector<128x128xf32>
    %c0_2 = arith.constant 0 : index
    %c0_3 = arith.constant 0 : index
    %4 = vector.load %arg3[%c0_2, %c0_3] : memref<128x256xf32, #tpu.memory_space<vmem>>, vector<128x256xf32>
    %cst = arith.constant dense<0.000000e+00> : vector<128x256xf32>
    %5 = tpu.matmul %3, %4, %cst {dimension_numbers = #tpu.dot_dimension_numbers<[1], [0], [0], [1], [0, 0, 1, 1], [], []>} : vector<128x128xf32>, vector<128x256xf32>, vector<128x256xf32> -> vector<128x256xf32>
    %c0_4 = arith.constant 0 : index
    %c0_5 = arith.constant 0 : index
    %6 = vector.load %arg4[%c0_4, %c0_5] : memref<1x256xf32, #tpu.memory_space<vmem>>, vector<1x256xf32>
    %7 = vector.broadcast %6 : vector<1x256xf32> to vector<128x256xf32>
    %8 = arith.addf %5, %7 : vector<128x256xf32>
    %9 = vector.extract_strided_slice %8 {offsets = [0, 0], sizes = [128, 128], strides = [1, 1]} : vector<128x256xf32> to vector<128x128xf32>
    %cst_6 = arith.constant 0.000000e+00 : f32
    %10 = vector.broadcast %cst_6 : f32 to vector<128x128xf32>
    %11 = arith.maximumf %9, %10 : vector<128x128xf32>
    %12 = vector.extract_strided_slice %8 {offsets = [0, 128], sizes = [128, 128], strides = [1, 1]} : vector<128x256xf32> to vector<128x128xf32>
    %13 = arith.mulf %11, %12 : vector<128x128xf32>
    %c0_7 = arith.constant 0 : index
    %c0_8 = arith.constant 0 : index
    %14 = vector.load %arg8[%c0_7, %c0_8] : memref<128x128xf32, #tpu.memory_space<vmem>>, vector<128x128xf32>
    %c0_9 = arith.constant 0 : index
    %c0_10 = arith.constant 0 : index
    %15 = vector.load %arg5[%c0_9, %c0_10] : memref<128x128xf32, #tpu.memory_space<vmem>>, vector<128x128xf32>
    %cst_11 = arith.constant dense<0.000000e+00> : vector<128x128xf32>
    %16 = tpu.matmul %13, %15, %cst_11 {dimension_numbers = #tpu.dot_dimension_numbers<[1], [0], [0], [1], [0, 0, 1, 1], [], []>} : vector<128x128xf32>, vector<128x128xf32>, vector<128x128xf32> -> vector<128x128xf32>
    %17 = arith.addf %14, %16 : vector<128x128xf32>
    %c0_12 = arith.constant 0 : index
    %c0_13 = arith.constant 0 : index
    %18 = vector.load %arg8[%c0_12, %c0_13] : memref<128x128xf32, #tpu.memory_space<vmem>>, vector<128x128xf32>
    tpu.vector_store %arg8[%c0_12, %c0_13], %17 {strides = array<i32>} : memref<128x128xf32, #tpu.memory_space<vmem>>, vector<128x128xf32>,
    %c0_i32_14 = arith.constant 0 : i32
    %19 = arith.cmpi eq, %arg1, %c0_i32_14 : i32
    %20 = arith.extui %19 : i1 to i32
    %c0_i32_15 = arith.constant 0 : i32
    %21 = arith.cmpi ne, %20, %c0_i32_15 : i32
    scf.if %21 {
      %c0_16 = arith.constant 0 : index
      %c0_17 = arith.constant 0 : index
      %22 = vector.load %arg8[%c0_16, %c0_17] : memref<128x128xf32, #tpu.memory_space<vmem>>, vector<128x128xf32>
      %c0_18 = arith.constant 0 : index
      %c0_19 = arith.constant 0 : index
      %23 = vector.load %arg6[%c0_18, %c0_19] : memref<1x128xf32, #tpu.memory_space<vmem>>, vector<1x128xf32>
      %24 = vector.broadcast %23 : vector<1x128xf32> to vector<128x128xf32>
      %25 = arith.addf %22, %24 : vector<128x128xf32>
      %c0_20 = arith.constant 0 : index
      %c0_21 = arith.constant 0 : index
      %26 = vector.load %arg7[%c0_20, %c0_21] : memref<128x128xf32, #tpu.memory_space<vmem>>, vector<128x128xf32>
      tpu.vector_store %arg7[%c0_20, %c0_21], %25 {strides = array<i32>} : memref<128x128xf32, #tpu.memory_space<vmem>>, vector<128x128xf32>,
    } else {
    }
    return
  }
  func.func @transform_0(%arg0: i32, %arg1: i32) -> (i32, i32) {
    %c0_i32 = arith.constant 0 : i32
    %c0_i32_0 = arith.constant 0 : i32
    return %arg0, %c0_i32 : i32, i32
  }
  func.func @transform_1(%arg0: i32, %arg1: i32) -> (i32, i32) {
    %c0_i32 = arith.constant 0 : i32
    %c0_i32_0 = arith.constant 0 : i32
    return %c0_i32, %arg1 : i32, i32
  }
  func.func @transform_2(%arg0: i32, %arg1: i32) -> (i32, i32) {
    %c0_i32 = arith.constant 0 : i32
    %c0_i32_0 = arith.constant 0 : i32
    return %c0_i32, %arg1 : i32, i32
  }
  func.func @transform_3(%arg0: i32, %arg1: i32) -> (i32, i32) {
    %c0_i32 = arith.constant 0 : i32
    %c0_i32_0 = arith.constant 0 : i32
    return %arg1, %c0_i32 : i32, i32
  }
  func.func @transform_4(%arg0: i32, %arg1: i32) -> (i32, i32) {
    %c0_i32 = arith.constant 0 : i32
    %c0_i32_0 = arith.constant 0 : i32
    %c0_i32_1 = arith.constant 0 : i32
    return %c0_i32, %c0_i32_0 : i32, i32
  }
  func.func @transform_5(%arg0: i32, %arg1: i32) -> (i32, i32) {
    %c0_i32 = arith.constant 0 : i32
    %c0_i32_0 = arith.constant 0 : i32
    return %arg0, %c0_i32 : i32, i32
  }
}

</mosaic_0001>

<bundles_post_ra>
// kernel: tpu_custom_call.1
= control target key start
LH: loop header
LB: loop body
LE: loop exit
PB: predicated region body
PF: predicated region fallthrough
CT: control target
= control target key end

     0   :  { %10 = vsyncpa [#allocation4], 0  ;;  %s922_s0 = inlined_call_operand.hbm [shape: f32[128,128], index: 0, kind: input, shape index: {}]   ;;  %s923_s1 = inlined_call_operand.hbm [shape: f32[128,256], index: 1, kind: input, shape index: {}]   ;;  %s924_s2 = inlined_call_operand.vmem [shape: f32[1,256], index: 2, kind: input, shape index: {}]   ;;  %s925_s3 = inlined_call_operand.hbm [shape: f32[128,128], index: 3, kind: input, shape index: {}]   ;;  %s926_s4 = inlined_call_operand.vmem [shape: f32[1,128], index: 4, kind: input, shape index: {}]   ;;  %s927_s5 = inlined_call_operand.hbm [shape: f32[128,128], index: 5, kind: output, shape index: {}]  }
   0x1   :  { %11 = vsyncpa [#allocation7], 0 }
   0x2   :  { %12 = vsyncpa [#allocation5], 0  ;;  %s804_s18 = smov [#allocation6]  }
   0x3   :  { %s30_s19 = sshll.u32 %s804_s18, 4  ;;  %s31_s19 = int_to_ptr.vmem [resolvable:$true] %s30_s19 }
   0x4   :  { %s726_s20 = scalar_lea.vmem %s31_s19, 4096  ;;  %p731_p1 = scmp.lt.s32.totalorder %s31_s19, %s31_s19 }
   0x5   :  { %p727_p0 = scmp.ne.s32.totalorder %s31_s19, %s726_s20  ;;  %p732_p2 = scmp.lt.s32.totalorder %s726_s20, %s726_s20 }
   0x7   :  { %p733_p3 = por %p732_p2, %p731_p1 }
   0x9   :  { %p734_p4 = pnand %p733_p3, %p727_p0 }
   0xb   :  { %737 = shalt.err (!%p734_p4)
}
   0xc   :  { %s805_s21 = smov 256   ;;  %s806_s22 = smov 16  }
   0xd   :  { %36 = dma.hbm_to_vmem [thread:$0]  %s923_s1, 4096, %s31_s19, [#allocation7], %s805_s21, %s805_s21, %s806_s22  }
   0xe   :  { %s807_s25 = smov [#allocation3]  }
   0xf   :  { %s18_s26 = sshll.u32 %s807_s25, 4  ;;  %s19_s26 = int_to_ptr.vmem [resolvable:$true] %s18_s26 }
  0x10   :  { %s746_s27 = scalar_lea.vmem %s19_s26, 2048  ;;  %p751_p6 = scmp.lt.s32.totalorder %s19_s26, %s19_s26 }
  0x11   :  { %p747_p5 = scmp.ne.s32.totalorder %s19_s26, %s746_s27  ;;  %p752_p7 = scmp.lt.s32.totalorder %s746_s27, %s746_s27 }
  0x13   :  { %p753_p8 = por %p752_p7, %p751_p6 }
  0x15   :  { %p754_p9 = pnand %p753_p8, %p747_p5 }
  0x17   :  { %757 = shalt.err (!%p754_p9)
}
  0x18   :  { %s808_s28 = smov 128   ;;  %s809_s29 = smov 8  }
  0x19   :  { %24 = dma.hbm_to_vmem [thread:$0]  %s922_s0, 2048, %s19_s26, [#allocation4], %s808_s28, %s808_s28, %s809_s29  }
  0x1a   :  { %s810_s1 = smov [#allocation8]  }
  0x1b   :  { %s44_s7 = sshll.u32 %s810_s1, 4  ;;  %s45_s7 = int_to_ptr.vmem [resolvable:$true] %s44_s7 }
  0x1c   :  { %s766_s8 = scalar_lea.vmem %s45_s7, 2048  ;;  %p771_p11 = scmp.lt.s32.totalorder %s45_s7, %s45_s7 }
  0x1d   :  { %p767_p10 = scmp.ne.s32.totalorder %s45_s7, %s766_s8  ;;  %p772_p12 = scmp.lt.s32.totalorder %s766_s8, %s766_s8 }
  0x1f   :  { %p773_p13 = por %p772_p12, %p771_p11 }
  0x21   :  { %p774_p0 = pnand %p773_p13, %p767_p10 }
  0x23   :  { %777 = shalt.err (!%p774_p0)
}
  0x24   :  { %50 = dma.hbm_to_vmem [thread:$0]  %s925_s3, 2048, %s45_s7, [#allocation7], %s808_s28, %s808_s28, %s809_s29  }
  0x25   :  { %798 = dma.done.wait [#allocation4], 2048  }
  0x26   :  { %799 = vsyncadd [#allocation4], 4294965248 }
  0x27   :  { %800 = dma.done.wait [#allocation7], 6144  }
  0x28   :  { %801 = vsyncadd [#allocation7], 4294961152  ;;  %v811_v0 = vmov 0.0   ;;  %v129_v1 = vld [vmem:[#allocation6 + $0xf8] sm:$0xff]  ;;  %v128_v2 = vld [vmem:[#allocation6 + $0xf0] sm:$0xff] }
  0x29   :  { %206 = vmatprep.mubr.f32.mxu0 %v811_v0  ;;  %v127_v3 = vld [vmem:[#allocation6 + $0xe8] sm:$0xff]  ;;  %142 = vmatprep.subr.mxu0 %v129_v1  ;;  %v126_v4 = vld [vmem:[#allocation6 + $0xe0] sm:$0xff]  ;;  %v125_v5 = vld [vmem:[#allocation6 + $0xd8] sm:$0xff] }
  0x2a   :  { %143 = vmatpush1.msra.mxu0 %v128_v2  ;;  %v124_v6 = vld [vmem:[#allocation6 + $0xd0] sm:$0xff]  ;;  %v123_v7 = vld [vmem:[#allocation6 + $0xc8] sm:$0xff]  ;;  %v122_v8 = vld [vmem:[#allocation6 + $0xc0] sm:$0xff]  ;;  %v132_v2 = vlaneseq }
  0x2b   :  { %144 = vmatprep.subr.mxu0 %v127_v3  ;;  %v121_v9 = vld [vmem:[#allocation6 + $0xb8] sm:$0xff]  ;;  %v120_v10 = vld [vmem:[#allocation6 + $0xb0] sm:$0xff]  ;;  %v119_v11 = vld [vmem:[#allocation6 + $0xa8] sm:$0xff] }
  0x2c   :  { %145 = vmatpush1.msra.mxu0 %v126_v4  ;;  %v118_v12 = vld [vmem:[#allocation6 + $0xa0] sm:$0xff]  ;;  %v117_v13 = vld [vmem:[#allocation6 + $0x98] sm:$0xff]  ;;  %v116_v14 = vld [vmem:[#allocation6 + $0x90] sm:$0xff]  ;;  %v133_v3 = vshrl.u32 %v132_v2, 7 }
  0x2d   :  { %146 = vmatprep.subr.mxu0 %v125_v5  ;;  %v115_v15 = vld [vmem:[#allocation6 + $0x88] sm:$0xff]  ;;  %v114_v16 = vld [vmem:[#allocation6 + $0x80] sm:$0xff]  ;;  %v113_v17 = vld [vmem:[#allocation6 + $0x78] sm:$0xff] }
  0x2e   :  { %147 = vmatpush1.msra.mxu0 %v124_v6  ;;  %v112_v18 = vld [vmem:[#allocation6 + $0x70] sm:$0xff]  ;;  %v111_v19 = vld [vmem:[#allocation6 + $0x68] sm:$0xff]  ;;  %v366_v20 = vld [vmem:[#allocation8 + $0x78] sm:$0xff]  ;;  %v138_v5 = vsub.s32 1, %v133_v3 }
  0x2f   :  { %148 = vmatprep.subr.mxu0 %v123_v7  ;;  %v365_v21 = vld [vmem:[#allocation8 + $0x70] sm:$0xff]  ;;  %v110_v22 = vld [vmem:[#allocation6 + $0x60] sm:$0xff]  ;;  %653 = vmatprep.subr.mxu1 %v366_v20  ;;  %v109_v23 = vld [vmem:[#allocation6 + $0x58] sm:$0xff] }
  0x30   :  { %149 = vmatpush1.msra.mxu0 %v122_v8  ;;  %654 = vmatpush3.msra.mxu1 %v366_v20  ;;  %v364_v24 = vld [vmem:[#allocation8 + $0x68] sm:$0xff]  ;;  %v108_v25 = vld [vmem:[#allocation6 + $0x50] sm:$0xff]  ;;  %v363_v27 = vld [vmem:[#allocation8 + $0x60] sm:$0xff] }
  0x31   :  { %150 = vmatprep.subr.mxu0 %v121_v9  ;;  %655 = vmatprep.subr.mxu1 %v365_v21  ;;  %v107_v26 = vld [vmem:[#allocation6 + $0x48] sm:$0xff]  ;;  %v106_v28 = vld [vmem:[#allocation6 + $0x40] sm:$0xff]  ;;  %v105_v29 = vld [vmem:[#allocation6 + $0x38] sm:$0xff] }
  0x32   :  { %151 = vmatpush1.msra.mxu0 %v120_v10  ;;  %656 = vmatpush3.msra.mxu1 %v365_v21  ;;  %v362_v30 = vld [vmem:[#allocation8 + $0x58] sm:$0xff]  ;;  %v104_v31 = vld [vmem:[#allocation6 + $0x30] sm:$0xff]  ;;  %v103_v32 = vld [vmem:[#allocation6 + $0x28] sm:$0xff] }
  0x33   :  { %152 = vmatprep.subr.mxu0 %v119_v11  ;;  %657 = vmatprep.subr.mxu1 %v364_v24  ;;  %v361_v33 = vld [vmem:[#allocation8 + $0x50] sm:$0xff]  ;;  %v102_v34 = vld [vmem:[#allocation6 + $0x20] sm:$0xff]  ;;  %v101_v35 = vld [vmem:[#allocation6 + $0x18] sm:$0xff] }
  0x34   :  { %153 = vmatpush1.msra.mxu0 %v118_v12  ;;  %658 = vmatpush3.msra.mxu1 %v364_v24  ;;  %v360_v36 = vld [vmem:[#allocation8 + $0x48] sm:$0xff]  ;;  %v100_v37 = vld [vmem:[#allocation6 + $0x10] sm:$0xff]  ;;  %v359_v39 = vld [vmem:[#allocation8 + $0x40] sm:$0xff] }
  0x35   :  { %154 = vmatprep.subr.mxu0 %v117_v13  ;;  %659 = vmatprep.subr.mxu1 %v363_v27  ;;  %v99_v38 = vld [vmem:[#allocation6 + $0x8] sm:$0xff]  ;;  %v98_v40 = vld [vmem:[#allocation6] sm:$0xff]  ;;  %v358_v42 = vld [vmem:[#allocation8 + $0x38] sm:$0xff] }
  0x36   :  { %155 = vmatpush1.msra.mxu0 %v116_v14  ;;  %660 = vmatpush3.msra.mxu1 %v363_v27  ;;  %v82_v41 = vld [vmem:[#allocation3] sm:$0xff]  ;;  %v357_v43 = vld [vmem:[#allocation8 + $0x30] sm:$0xff]  ;;  %v83_v44 = vld [vmem:[#allocation3 + $0x8] sm:$0xff] }
  0x37   :  { %156 = vmatprep.subr.mxu0 %v115_v15  ;;  %661 = vmatprep.subr.mxu1 %v362_v30  ;;  %v356_v45 = vld [vmem:[#allocation8 + $0x28] sm:$0xff]  ;;  %v84_v46 = vld [vmem:[#allocation3 + $0x10] sm:$0xff]  ;;  %v85_v47 = vld [vmem:[#allocation3 + $0x18] sm:$0xff] }
  0x38   :  { %157 = vmatpush1.msra.mxu0 %v114_v16  ;;  %662 = vmatpush3.msra.mxu1 %v362_v30  ;;  %v86_v48 = vld [vmem:[#allocation3 + $0x20] sm:$0xff]  ;;  %v87_v49 = vld [vmem:[#allocation3 + $0x28] sm:$0xff]  ;;  %v88_v50 = vld [vmem:[#allocation3 + $0x30] sm:$0xff] }
  0x39   :  { %158 = vmatprep.subr.mxu0 %v113_v17  ;;  %663 = vmatprep.subr.mxu1 %v361_v33  ;;  %v89_v51 = vld [vmem:[#allocation3 + $0x38] sm:$0xff]  ;;  %v90_v52 = vld [vmem:[#allocation3 + $0x40] sm:$0xff]  ;;  %v91_v53 = vld [vmem:[#allocation3 + $0x48] sm:$0xff] }
  0x3a   :  { %159 = vmatpush1.msra.mxu0 %v112_v18  ;;  %664 = vmatpush3.msra.mxu1 %v361_v33  ;;  %v92_v54 = vld [vmem:[#allocation3 + $0x50] sm:$0xff]  ;;  %v93_v55 = vld [vmem:[#allocation3 + $0x58] sm:$0xff]  ;;  %v94_v56 = vld [vmem:[#allocation3 + $0x60] sm:$0xff] }
  0x3b   :  { %160 = vmatprep.subr.mxu0 %v111_v19  ;;  %665 = vmatprep.subr.mxu1 %v360_v36  ;;  %v95_v57 = vld [vmem:[#allocation3 + $0x68] sm:$0xff]  ;;  %v96_v58 = vld [vmem:[#allocation3 + $0x70] sm:$0xff]  ;;  %v97_v59 = vld [vmem:[#allocation3 + $0x78] sm:$0xff] }
  0x3c   :  { %161 = vmatpush1.msra.mxu0 %v110_v22  ;;  %666 = vmatpush3.msra.mxu1 %v360_v36  ;;  %v355_v60 = vld [vmem:[#allocation8 + $0x20] sm:$0xff]  ;;  %v354_v61 = vld [vmem:[#allocation8 + $0x18] sm:$0xff]  ;;  %v353_v62 = vld [vmem:[#allocation8 + $0x10] sm:$0xff] }
  0x3d   :  { %162 = vmatprep.subr.mxu0 %v109_v23  ;;  %667 = vmatprep.subr.mxu1 %v359_v39  ;;  %v352_v63 = vld [vmem:[#allocation8 + $0x8] sm:$0xff]  ;;  %v351_v1 = vld [vmem:[#allocation8] sm:$0xff] }
  0x3e   :  { %163 = vmatpush1.msra.mxu0 %v108_v25  ;;  %668 = vmatpush3.msra.mxu1 %v359_v39  ;;  %v130_v4 = vld [vmem:[%s924_s2] sm:$0x3] }
  0x3f   :  { %164 = vmatprep.subr.mxu0 %v107_v26  ;;  %669 = vmatprep.subr.mxu1 %v358_v42  ;;  %v879_v7 = vrot.slane %v130_v4, %v138_v5 }
  0x40   :  { %165 = vmatpush1.msra.mxu0 %v106_v28  ;;  %670 = vmatpush3.msra.mxu1 %v358_v42 }
  0x41   :  { %166 = vmatprep.subr.mxu0 %v105_v29  ;;  %671 = vmatprep.subr.mxu1 %v357_v43 }
  0x42   :  { %167 = vmatpush1.msra.mxu0 %v104_v31  ;;  %672 = vmatpush3.msra.mxu1 %v357_v43 }
  0x43   :  { %168 = vmatprep.subr.mxu0 %v103_v32  ;;  %673 = vmatprep.subr.mxu1 %v356_v45 }
  0x44   :  { %169 = vmatpush1.msra.mxu0 %v102_v34  ;;  %674 = vmatpush3.msra.mxu1 %v356_v45 }
  0x45   :  { %170 = vmatprep.subr.mxu0 %v101_v35  ;;  %675 = vmatprep.subr.mxu1 %v355_v60 }
  0x46   :  { %171 = vmatpush1.msra.mxu0 %v100_v37  ;;  %676 = vmatpush3.msra.mxu1 %v355_v60 }
  0x47   :  { %172 = vmatprep.subr.mxu0 %v99_v38  ;;  %677 = vmatprep.subr.mxu1 %v354_v61 }
  0x48   :  { %173 = vmatpush1.msra.mxu0 %v98_v40  ;;  %678 = vmatpush3.msra.mxu1 %v354_v61 }
  0x49   :  { %207 = vmatmul.mubr.f32.vlgmr.msra.gmra.mxu0 %v82_v41  ;;  %679 = vmatprep.subr.mxu1 %v353_v62 }
  0x4a   :  { %212 = vmatprep.mubr.f32.mxu0 %v811_v0  ;;  %680 = vmatpush3.msra.mxu1 %v353_v62 }
  0x4b   :  { %681 = vmatprep.subr.mxu1 %v352_v63 }
  0x4c   :  { %682 = vmatpush3.msra.mxu1 %v352_v63 }
  0x4d   :  { %213 = vmatmul.mubr.f32.gmra.mxu0 %v83_v44  ;;  %683 = vmatprep.subr.mxu1 %v351_v1 }
  0x4e   :  { %218 = vmatprep.mubr.f32.mxu0 %v811_v0  ;;  %684 = vmatpush3.msra.mxu1 %v351_v1 }
  0x51   :  { %219 = vmatmul.mubr.f32.gmra.mxu0 %v84_v46 }
  0x52   :  { %224 = vmatprep.mubr.f32.mxu0 %v811_v0 }
  0x55   :  { %225 = vmatmul.mubr.f32.gmra.mxu0 %v85_v47 }
  0x56   :  { %230 = vmatprep.mubr.f32.mxu0 %v811_v0 }
  0x59   :  { %231 = vmatmul.mubr.f32.gmra.mxu0 %v86_v48 }
  0x5a   :  { %236 = vmatprep.mubr.f32.mxu0 %v811_v0 }
  0x5d   :  { %237 = vmatmul.mubr.f32.gmra.mxu0 %v87_v49 }
  0x5e   :  { %242 = vmatprep.mubr.f32.mxu0 %v811_v0 }
  0x61   :  { %243 = vmatmul.mubr.f32.gmra.mxu0 %v88_v50 }
  0x62   :  { %248 = vmatprep.mubr.f32.mxu0 %v811_v0 }
  0x65   :  { %249 = vmatmul.mubr.f32.gmra.mxu0 %v89_v51 }
  0x66   :  { %254 = vmatprep.mubr.f32.mxu0 %v811_v0 }
  0x69   :  { %255 = vmatmul.mubr.f32.gmra.mxu0 %v90_v52 }
  0x6a   :  { %260 = vmatprep.mubr.f32.mxu0 %v811_v0 }
  0x6d   :  { %261 = vmatmul.mubr.f32.gmra.mxu0 %v91_v53 }
  0x6e   :  { %266 = vmatprep.mubr.f32.mxu0 %v811_v0 }
  0x71   :  { %267 = vmatmul.mubr.f32.gmra.mxu0 %v92_v54 }
  0x72   :  { %272 = vmatprep.mubr.f32.mxu0 %v811_v0 }
  0x75   :  { %273 = vmatmul.mubr.f32.gmra.mxu0 %v93_v55 }
  0x76   :  { %278 = vmatprep.mubr.f32.mxu0 %v811_v0 }
  0x79   :  { %279 = vmatmul.mubr.f32.gmra.mxu0 %v94_v56 }
  0x7a   :  { %284 = vmatprep.mubr.f32.mxu0 %v811_v0 }
  0x7d   :  { %285 = vmatmul.mubr.f32.gmra.mxu0 %v95_v57 }
  0x7e   :  { %290 = vmatprep.mubr.f32.mxu0 %v811_v0 }
  0x81   :  { %291 = vmatmul.mubr.f32.gmra.mxu0 %v96_v58 }
  0x82   :  { %296 = vmatprep.mubr.f32.mxu0 %v811_v0  ;;  %v134_v0 = vsub.s32 0, %v133_v3 }
  0x84   :  { %v877_v6 = vrot.slane %v130_v4, %v134_v0 }
  0x85   :  { %297 = vmatmul.mubr.f32.gmra.mxu0 %v97_v59 }
 0x109   :  { %v208_v8 = vpop.f32.mrf.mxu0 }
 0x10a   :  { %v209_v9 = vadd.f32 %v208_v8, %v877_v6 }
 0x10b   :  { %v210_v10 = vpop.f32.mrf.mxu0 }
 0x10c   :  { %v303_v11 = vmax.f32 %v209_v9, 0.0  ;;  %v211_v12 = vadd.f32 %v210_v10, %v879_v7 }
 0x10d   :  { %v214_v13 = vpop.f32.mrf.mxu0 }
 0x10e   :  { %v215_v14 = vadd.f32 %v214_v13, %v877_v6  ;;  %v319_v15 = vmul.f32 %v303_v11, %v211_v12 }
 0x10f   :  { %v216_v16 = vpop.f32.mrf.mxu0 }
 0x110   :  { %v304_v17 = vmax.f32 %v215_v14, 0.0  ;;  %v217_v18 = vadd.f32 %v216_v16, %v879_v7  ;;  %685 = vmatprep.mubr.f32.mxu1 %v319_v15 }
 0x111   :  { %v220_v19 = vpop.f32.mrf.mxu0 }
 0x112   :  { %v320_v20 = vmul.f32 %v304_v17, %v217_v18  ;;  %v221_v21 = vadd.f32 %v220_v19, %v877_v6 }
 0x113   :  { %v222_v22 = vpop.f32.mrf.mxu0 }
 0x114   :  { %v305_v23 = vmax.f32 %v221_v21, 0.0  ;;  %v223_v24 = vadd.f32 %v222_v22, %v879_v7  ;;  %686 = vmatmul.mubr.f32.vlgmr.msra.gmra.mxu1 %v320_v20 }
 0x115   :  { %v226_v25 = vpop.f32.mrf.mxu0 }
 0x116   :  { %v321_v26 = vmul.f32 %v305_v23, %v223_v24  ;;  %v227_v27 = vadd.f32 %v226_v25, %v877_v6 }
 0x117   :  { %v228_v28 = vpop.f32.mrf.mxu0 }
 0x118   :  { %v306_v29 = vmax.f32 %v227_v27, 0.0  ;;  %v229_v30 = vadd.f32 %v228_v28, %v879_v7  ;;  %688 = vmatprep.mubr.f32.mxu1 %v321_v26 }
 0x119   :  { %v232_v31 = vpop.f32.mrf.mxu0 }
 0x11a   :  { %v322_v32 = vmul.f32 %v306_v29, %v229_v30  ;;  %v233_v33 = vadd.f32 %v232_v31, %v877_v6 }
 0x11b   :  { %v234_v34 = vpop.f32.mrf.mxu0 }
 0x11c   :  { %v307_v35 = vmax.f32 %v233_v33, 0.0  ;;  %v235_v36 = vadd.f32 %v234_v34, %v879_v7  ;;  %689 = vmatmul.mubr.f32.gmra.mxu1 %v322_v32 }
 0x11d   :  { %v238_v37 = vpop.f32.mrf.mxu0 }
 0x11e   :  { %v323_v38 = vmul.f32 %v307_v35, %v235_v36  ;;  %v239_v39 = vadd.f32 %v238_v37, %v877_v6 }
 0x11f   :  { %v240_v40 = vpop.f32.mrf.mxu0 }
 0x120   :  { %v308_v41 = vmax.f32 %v239_v39, 0.0  ;;  %v241_v42 = vadd.f32 %v240_v40, %v879_v7  ;;  %691 = vmatprep.mubr.f32.mxu1 %v323_v38 }
 0x121   :  { %v244_v43 = vpop.f32.mrf.mxu0 }
 0x122   :  { %v324_v44 = vmul.f32 %v308_v41, %v241_v42  ;;  %v245_v45 = vadd.f32 %v244_v43, %v877_v6  ;;  %v620_v42 = vld [vmem:[%s926_s4] ss:$0 sm:$0xff]  ;;  %s812_s4 = smov [#allocation9]  }
 0x123   :  { %v246_v46 = vpop.f32.mrf.mxu0  ;;  %s607_s12 = sshll.u32 %s812_s4, 4  ;;  %s608_s12 = int_to_ptr.vmem [resolvable:$true] %s607_s12 }
 0x124   :  { %v309_v47 = vmax.f32 %v245_v45, 0.0  ;;  %v247_v48 = vadd.f32 %v246_v46, %v879_v7  ;;  %692 = vmatmul.mubr.f32.gmra.mxu1 %v324_v44  ;;  %s778_s13 = scalar_lea.vmem %s608_s12, 2048  ;;  %p783_p2 = scmp.lt.s32.totalorder %s608_s12, %s608_s12 }
 0x125   :  { %v250_v49 = vpop.f32.mrf.mxu0  ;;  %p779_p1 = scmp.ne.s32.totalorder %s608_s12, %s778_s13  ;;  %p784_p3 = scmp.lt.s32.totalorder %s778_s13, %s778_s13 }
 0x126   :  { %v325_v50 = vmul.f32 %v309_v47, %v247_v48  ;;  %v251_v51 = vadd.f32 %v250_v49, %v877_v6 }
 0x127   :  { %v252_v52 = vpop.f32.mrf.mxu0  ;;  %p785_p4 = por %p784_p3, %p783_p2 }
 0x128   :  { %v310_v53 = vmax.f32 %v251_v51, 0.0  ;;  %v253_v54 = vadd.f32 %v252_v52, %v879_v7  ;;  %694 = vmatprep.mubr.f32.mxu1 %v325_v50 }
 0x129   :  { %v256_v55 = vpop.f32.mrf.mxu0  ;;  %p786_p5 = pnand %p785_p4, %p779_p1 }
 0x12a   :  { %v326_v56 = vmul.f32 %v310_v53, %v253_v54  ;;  %v257_v57 = vadd.f32 %v256_v55, %v877_v6 }
 0x12b   :  { %v258_v58 = vpop.f32.mrf.mxu0 }
 0x12c   :  { %v311_v59 = vmax.f32 %v257_v57, 0.0  ;;  %v259_v60 = vadd.f32 %v258_v58, %v879_v7  ;;  %695 = vmatmul.mubr.f32.gmra.mxu1 %v326_v56 }
 0x12d   :  { %v262_v61 = vpop.f32.mrf.mxu0 }
 0x12e   :  { %v327_v62 = vmul.f32 %v311_v59, %v259_v60  ;;  %v263_v63 = vadd.f32 %v262_v61, %v877_v6 }
 0x12f   :  { %v264_v1 = vpop.f32.mrf.mxu0 }
 0x130   :  { %v312_v2 = vmax.f32 %v263_v63, 0.0  ;;  %v265_v3 = vadd.f32 %v264_v1, %v879_v7  ;;  %697 = vmatprep.mubr.f32.mxu1 %v327_v62 }
 0x131   :  { %v268_v0 = vpop.f32.mrf.mxu0 }
 0x132   :  { %v328_v4 = vmul.f32 %v312_v2, %v265_v3  ;;  %v269_v5 = vadd.f32 %v268_v0, %v877_v6 }
 0x133   :  { %v270_v8 = vpop.f32.mrf.mxu0 }
 0x134   :  { %v313_v9 = vmax.f32 %v269_v5, 0.0  ;;  %v271_v10 = vadd.f32 %v270_v8, %v879_v7  ;;  %698 = vmatmul.mubr.f32.gmra.mxu1 %v328_v4 }
 0x135   :  { %v274_v11 = vpop.f32.mrf.mxu0 }
 0x136   :  { %v329_v12 = vmul.f32 %v313_v9, %v271_v10  ;;  %v275_v13 = vadd.f32 %v274_v11, %v877_v6 }
 0x137   :  { %v276_v14 = vpop.f32.mrf.mxu0 }
 0x138   :  { %v314_v15 = vmax.f32 %v275_v13, 0.0  ;;  %v277_v16 = vadd.f32 %v276_v14, %v879_v7  ;;  %700 = vmatprep.mubr.f32.mxu1 %v329_v12 }
 0x139   :  { %v280_v17 = vpop.f32.mrf.mxu0 }
 0x13a   :  { %v330_v18 = vmul.f32 %v314_v15, %v277_v16  ;;  %v281_v19 = vadd.f32 %v280_v17, %v877_v6 }
 0x13b   :  { %v282_v20 = vpop.f32.mrf.mxu0 }
 0x13c   :  { %v315_v21 = vmax.f32 %v281_v19, 0.0  ;;  %v283_v22 = vadd.f32 %v282_v20, %v879_v7  ;;  %701 = vmatmul.mubr.f32.gmra.mxu1 %v330_v18 }
 0x13d   :  { %v286_v23 = vpop.f32.mrf.mxu0 }
 0x13e   :  { %v331_v24 = vmul.f32 %v315_v21, %v283_v22  ;;  %v287_v25 = vadd.f32 %v286_v23, %v877_v6 }
 0x13f   :  { %v288_v26 = vpop.f32.mrf.mxu0 }
 0x140   :  { %v316_v27 = vmax.f32 %v287_v25, 0.0  ;;  %v289_v28 = vadd.f32 %v288_v26, %v879_v7  ;;  %703 = vmatprep.mubr.f32.mxu1 %v331_v24 }
 0x141   :  { %v292_v29 = vpop.f32.mrf.mxu0 }
 0x142   :  { %v332_v30 = vmul.f32 %v316_v27, %v289_v28  ;;  %v293_v31 = vadd.f32 %v292_v29, %v877_v6 }
 0x143   :  { %v294_v32 = vpop.f32.mrf.mxu0 }
 0x144   :  { %v317_v33 = vmax.f32 %v293_v31, 0.0  ;;  %v295_v34 = vadd.f32 %v294_v32, %v879_v7  ;;  %704 = vmatmul.mubr.f32.gmra.mxu1 %v332_v30 }
 0x145   :  { %v298_v35 = vpop.f32.mrf.mxu0 }
 0x146   :  { %v333_v36 = vmul.f32 %v317_v33, %v295_v34  ;;  %v299_v37 = vadd.f32 %v298_v35, %v877_v6 }
 0x147   :  { %v300_v38 = vpop.f32.mrf.mxu0 }
 0x148   :  { %v318_v39 = vmax.f32 %v299_v37, 0.0  ;;  %v301_v40 = vadd.f32 %v300_v38, %v879_v7  ;;  %706 = vmatprep.mubr.f32.mxu1 %v333_v36 }
 0x14a   :  { %v334_v41 = vmul.f32 %v318_v39, %v301_v40 }
 0x14c   :  { %707 = vmatmul.mubr.f32.gmra.mxu1 %v334_v41 }
 0x1d4   :  { %v687_v43 = vpop.f32.mrf.mxu1 }
 0x1d5   :  { %v571_v44 = vadd.f32 %v687_v43, %v620_v42 }
 0x1d6   :  { %v433_v45 = vpop.f32.mrf.mxu1 }
 0x1d7   :  { %587 = vst [vmem:[#allocation9 + $0x8] sm:$0xff] %v571_v44  ;;  %v570_v46 = vadd.f32 %v620_v42, %v433_v45 }
 0x1d9   :  { %586 = vst [vmem:[#allocation9] sm:$0xff] %v570_v46 }
 0x1dc   :  { %v690_v47 = vpop.f32.mrf.mxu1 }
 0x1dd   :  { %v573_v48 = vadd.f32 %v690_v47, %v620_v42 }
 0x1de   :  { %v443_v6 = vpop.f32.mrf.mxu1 }
 0x1df   :  { %589 = vst [vmem:[#allocation9 + $0x18] sm:$0xff] %v573_v48  ;;  %v572_v49 = vadd.f32 %v620_v42, %v443_v6 }
 0x1e1   :  { %588 = vst [vmem:[#allocation9 + $0x10] sm:$0xff] %v572_v49 }
 0x1e4   :  { %v693_v7 = vpop.f32.mrf.mxu1 }
 0x1e5   :  { %v575_v50 = vadd.f32 %v693_v7, %v620_v42 }
 0x1e6   :  { %v453_v51 = vpop.f32.mrf.mxu1 }
 0x1e7   :  { %591 = vst [vmem:[#allocation9 + $0x28] sm:$0xff] %v575_v50  ;;  %v574_v52 = vadd.f32 %v620_v42, %v453_v51 }
 0x1e9   :  { %590 = vst [vmem:[#allocation9 + $0x20] sm:$0xff] %v574_v52 }
 0x1ec   :  { %v696_v53 = vpop.f32.mrf.mxu1 }
 0x1ed   :  { %v577_v54 = vadd.f32 %v696_v53, %v620_v42 }
 0x1ee   :  { %v463_v55 = vpop.f32.mrf.mxu1 }
 0x1ef   :  { %593 = vst [vmem:[#allocation9 + $0x38] sm:$0xff] %v577_v54  ;;  %v576_v56 = vadd.f32 %v620_v42, %v463_v55 }
 0x1f1   :  { %592 = vst [vmem:[#allocation9 + $0x30] sm:$0xff] %v576_v56 }
 0x1f4   :  { %v699_v57 = vpop.f32.mrf.mxu1 }
 0x1f5   :  { %v579_v58 = vadd.f32 %v699_v57, %v620_v42 }
 0x1f6   :  { %v473_v59 = vpop.f32.mrf.mxu1 }
 0x1f7   :  { %595 = vst [vmem:[#allocation9 + $0x48] sm:$0xff] %v579_v58  ;;  %v578_v60 = vadd.f32 %v620_v42, %v473_v59 }
 0x1f9   :  { %594 = vst [vmem:[#allocation9 + $0x40] sm:$0xff] %v578_v60 }
 0x1fc   :  { %v702_v61 = vpop.f32.mrf.mxu1 }
 0x1fd   :  { %v581_v62 = vadd.f32 %v702_v61, %v620_v42 }
 0x1fe   :  { %v483_v63 = vpop.f32.mrf.mxu1 }
 0x1ff   :  { %597 = vst [vmem:[#allocation9 + $0x58] sm:$0xff] %v581_v62  ;;  %v580_v1 = vadd.f32 %v620_v42, %v483_v63 }
 0x201   :  { %596 = vst [vmem:[#allocation9 + $0x50] sm:$0xff] %v580_v1 }
 0x204   :  { %v705_v2 = vpop.f32.mrf.mxu1 }
 0x205   :  { %v583_v3 = vadd.f32 %v705_v2, %v620_v42 }
 0x206   :  { %v493_v0 = vpop.f32.mrf.mxu1 }
 0x207   :  { %599 = vst [vmem:[#allocation9 + $0x68] sm:$0xff] %v583_v3  ;;  %v582_v4 = vadd.f32 %v620_v42, %v493_v0 }
 0x209   :  { %598 = vst [vmem:[#allocation9 + $0x60] sm:$0xff] %v582_v4 }
 0x20c   :  { %v708_v5 = vpop.f32.mrf.mxu1 }
 0x20d   :  { %v585_v8 = vadd.f32 %v708_v5, %v620_v42 }
 0x20e   :  { %v503_v9 = vpop.f32.mrf.mxu1 }
 0x20f   :  { %601 = vst [vmem:[#allocation9 + $0x78] sm:$0xff] %v585_v8  ;;  %v584_v10 = vadd.f32 %v620_v42, %v503_v9 }
 0x211   :  { %600 = vst [vmem:[#allocation9 + $0x70] sm:$0xff] %v584_v10 }
 0x212   :  { %789 = shalt.err (!%p786_p5)
}
 0x213   :  { %613 = dma.vmem_to_hbm [thread:$0]  %s608_s12, 2048, %s927_s5, [#allocation5], %s808_s28, %s808_s28, %s809_s29  }
 0x214   :  { %802 = dma.done.wait [#allocation5], 2048  }
 0x215   :  { %803 = vsyncadd [#allocation5], 4294965248 }
 0x216   :  { %617 = vsyncpa [#allocation4], 1 }
 0x217   :  { %618 = vsyncpa [#allocation7], 1 }
 0x218   :  { %619 = vsyncpa [#allocation5], 1 }

</bundles_post_ra>
